<compile_context>
chip_gen: v5e
topology: v5e:2x2
jax: 0.10.0
libtpu: 0.0.40
codegen_flags: <defaults>
</compile_context>

<pallas_src>
import functools

import jax
import jax.numpy as jnp
from jax.experimental import pallas as pl
from jax.experimental.pallas import tpu as pltpu


def _mlp_kernel(*refs, tile_i, num_i, eps, compute_stat):
    # With stat:    x, wgu, wd, out, stat, acc, rss, sq
    # Without stat: x, wgu, wd, out, acc
    if compute_stat:
        (x_ref, wgu_ref, wd_ref, out_ref, stat_ref,
         acc_ref, rss_ref, sq_ref) = refs
    else:
        x_ref, wgu_ref, wd_ref, out_ref, acc_ref = refs

    i = pl.program_id(2)

    @pl.when(i == 0)
    def _():
        acc_ref[...] = jnp.zeros_like(acc_ref)
        if compute_stat:
            rss_ref[...] = jnp.zeros_like(rss_ref)

    x = x_ref[0]                                                   # (S_t, H)

    # Fused gate|up projection: one wide MXU matmul, lane-aligned halves
    # (tile_i is asserted to be a multiple of 128 so the split is free).
    gu = jnp.dot(x, wgu_ref[...], preferred_element_type=jnp.float32)
    gate = gu[:, :tile_i]
    up = gu[:, tile_i:]
    int_f32 = (gate * jax.nn.sigmoid(gate)) * up                   # SiLU * up

    if compute_stat:
        # GRIFFIN bookkeeping: stash int^2 (low precision), accumulate the
        # per-row sum of squares across I tiles.
        sq = int_f32 * int_f32
        sq_ref[i] = sq.astype(sq_ref.dtype)
        rss_ref[...] += jnp.sum(sq, axis=-1, keepdims=True)

    # Down projection, accumulated over I tiles.  Weight pre-transposed to
    # (I, H): plain nn-form matmul, no per-step relayout of the weight tile.
    acc_ref[...] += jnp.dot(int_f32.astype(x.dtype), wd_ref[...],
                            preferred_element_type=jnp.float32)

    @pl.when(i == num_i - 1)
    def _():
        out_ref[0] = acc_ref[...].astype(out_ref.dtype)
        if compute_stat:
            # stat_partial_j = sum_s int_sj^2 / (sum_k int_sk^2 + eps)
            # Exact reciprocal (epilogue-only) so top-k selection is faithful.
            inv = pl.reciprocal(rss_ref[...] + eps, approx=False)   # (S_t, 1)
            ones_row = jnp.ones((1, rss_ref.shape[0]), dtype=jnp.float32)
            for t in range(num_i):  # static unroll, static slices
                scaled = sq_ref[t].astype(jnp.float32) * inv        # (S_t, tile_i)
                # Sublane reduction on the (otherwise idle) MXU.
                stat_ref[0, 0, :, t * tile_i:(t + 1) * tile_i] = jnp.dot(
                    ones_row, scaled, preferred_element_type=jnp.float32)


def prepare_weights(gate_w, up_w, down_w, tile_i):
    """One-time weight prep (do this OUTSIDE jit, once per model).

    gate_w/up_w: (I, H) torch nn.Linear layout; down_w: (H, I).
    Returns (wgu, wd_t):
      wgu  (H, 2*I): gate/up column tiles of width tile_i interleaved so one
                     BlockSpec tile carries both projections.
      wd_t (I, H):   down weight pre-transposed so the kernel's contraction is
                     a plain nn-form matmul with row-contiguous weight DMA."""
    I, H = gate_w.shape
    assert I % tile_i == 0, "tile_i must divide intermediate_size"
    num_i = I // tile_i
    wg_t = jnp.asarray(gate_w).T.reshape(H, num_i, tile_i)
    wu_t = jnp.asarray(up_w).T.reshape(H, num_i, tile_i)
    wgu = jnp.concatenate([wg_t, wu_t], axis=2).reshape(H, 2 * I)
    wd_t = jnp.asarray(down_w).T                                   # (I, H)
    return wgu, wd_t


def _pick_seq_tile(seq, itemsize, preferred=512):
    # Align to the dtype's sublane packing: 8 rows (f32), 16 (bf16), 32 (8-bit).
    align = {4: 8, 2: 16, 1: 32}.get(itemsize, 8)
    for cand in range(min(seq, preferred), 0, -1):
        if seq % cand == 0 and cand % align == 0:
            return cand
    return seq


def _default_vmem_limit():
    """Generation-aware scoped-VMEM limit (~52 MiB on v7x, ~104 MiB on v5e/v6e)."""
    cap = 128 * 1024 * 1024
    try:
        info = pltpu.get_tpu_info()
        cap = int(getattr(info, "vmem_capacity_bytes", cap)) or cap
    except Exception:
        pass
    return max(32 * 1024 * 1024, cap * 13 // 16)


def llama_mlp_forward(x, wgu, wd, *, tile_i, tile_s=None, k_factor=0.5,
                      selection_method="topk", eps=1e-12,
                      vmem_limit_bytes=None):
    """GRIFFIN LlamaMLP forward (gen mode, seq > 1).

    x: (B, S, H); (wgu, wd) from prepare_weights (tile_i must match).
    tile_s guidance: ~256 on v5e, 512-1024 on v6e, 384-512 on v7x (default
    picker prefers 512).  Returns (down_proj (B,S,H), neuron_stat (B,I) f32 or
    None, topk_indices or None)."""
    B, S, H = x.shape
    I = wgu.shape[1] // 2
    assert wgu.shape == (H, 2 * I)
    assert wd.shape == (I, H), "wd must be pre-transposed to (I, H); use prepare_weights"
    assert I % tile_i == 0
    assert tile_i % 128 == 0, "tile_i must be a lane multiple (prefer 256 on v6e/v7x)"
    assert H % 128 == 0, "hidden_size must be a lane multiple"

    itemsize = jnp.dtype(x.dtype).itemsize
    if tile_s is None:
        tile_s = _pick_seq_tile(S, itemsize)
    assert S % tile_s == 0
    num_m = S // tile_s
    num_i = I // tile_i

    compute_stat = (selection_method != "magnitude") and (k_factor > 0.0)

    if vmem_limit_bytes is None:
        vmem_limit_bytes = _default_vmem_limit()

    # Weight bytes are re-streamed per (batch, seq-tile) with I innermost.
    cost = pl.CostEstimate(
        flops=6 * B * S * H * I,
        transcendentals=B * S * I,
        bytes_accessed=(2 * B * S * H * itemsize
                        + B * num_m * 3 * H * I * itemsize
                        + (B * num_m * I * 4 if compute_stat else 0)),
    )

    kernel = functools.partial(_mlp_kernel, tile_i=tile_i, num_i=num_i,
                               eps=eps, compute_stat=compute_stat)

    out_shape = [jax.ShapeDtypeStruct((B, S, H), x.dtype)]
    out_specs = [pl.BlockSpec((1, tile_s, H), lambda b, m, i: (b, m, 0))]
    scratch = [pltpu.VMEM((tile_s, H), jnp.float32)]               # down acc
    if compute_stat:
        out_shape.append(jax.ShapeDtypeStruct((B, num_m, 1, I), jnp.float32))
        out_specs.append(pl.BlockSpec((1, 1, 1, I), lambda b, m, i: (b, m, 0, 0)))
        scratch += [
            pltpu.VMEM((tile_s, 1), jnp.float32),                  # row sum of squares
            pltpu.VMEM((num_i, tile_s, tile_i), x.dtype),          # int^2 stash (low prec)
        ]

    results = pl.pallas_call(
        kernel,
        out_shape=tuple(out_shape),
        grid_spec=pltpu.PrefetchScalarGridSpec(
            num_scalar_prefetch=0,
            grid=(B, num_m, num_i),
            in_specs=[
                pl.BlockSpec((1, tile_s, H), lambda b, m, i: (b, m, 0)),
                pl.BlockSpec((H, 2 * tile_i), lambda b, m, i: (0, i)),
                pl.BlockSpec((tile_i, H), lambda b, m, i: (i, 0)),
            ],
            out_specs=tuple(out_specs),
            scratch_shapes=scratch,
        ),
        compiler_params=pltpu.CompilerParams(
            dimension_semantics=("parallel", "parallel", "arbitrary"),
            vmem_limit_bytes=int(vmem_limit_bytes),
        ),
        cost_estimate=cost,
    )(x, wgu, wd)

    if not compute_stat:
        # TODO(synk): fp8 (v7x) / int8 (v6e) weight variants with per-tile scales
        # are a further bandwidth lever; not needed for numerical parity here.
        return results[0], None, None

    out, stat_partial = results
    # Finalize GRIFFIN stat: combine per-seq-tile partials, sqrt.  (B, I) f32.
    neuron_stat = jnp.sqrt(jnp.sum(stat_partial[:, :, 0, :], axis=1))

    k = int(I * k_factor)
    _, topk_indices = jax.lax.top_k(neuron_stat, k)
    # TODO(synk): prepare_reduced_weights (gathering reduced gate/up/down
    # matrices for the single-token decode path) is parameter plumbing done
    # outside the kernel when needed.
    return out, neuron_stat, topk_indices


def _reference(x, gate_w, up_w, down_w):
    gate = x @ gate_w.T
    up = x @ up_w.T
    inter = jax.nn.silu(gate) * up
    out = inter @ down_w.T
    row_norm = jnp.linalg.norm(inter, axis=-1, keepdims=True)
    stat = jnp.linalg.norm(inter / row_norm, axis=1)
    return out, stat


if __name__ == "__main__":
    # Small, TPU-tile-friendly config that still exercises the I-tiled path.
    batch, seq, hidden, intermediate = 2, 16, 128, 256
    TILE_I = 128          # 2 I-tiles -> exercises the accumulator/stat path
    k_factor = 0.5

    key = jax.random.PRNGKey(0)
    kx, kg, ku, kd = jax.random.split(key, 4)
    x = jax.random.normal(kx, (batch, seq, hidden), dtype=jnp.float32)
    # nn.Linear(hidden, intermediate).weight -> (intermediate, hidden)
    gate_w = jax.random.normal(kg, (intermediate, hidden), dtype=jnp.float32) * 0.05
    up_w = jax.random.normal(ku, (intermediate, hidden), dtype=jnp.float32) * 0.05
    # nn.Linear(intermediate, hidden).weight -> (hidden, intermediate)
    down_w = jax.random.normal(kd, (hidden, intermediate), dtype=jnp.float32) * 0.05

    # One-time weight prep outside jit (no per-call transposes/copies).
    wgu, wd = prepare_weights(gate_w, up_w, down_w, TILE_I)

    ref_out, ref_stat = _reference(x, gate_w, up_w, down_w)

    # 1) f32 run with GRIFFIN stat: exact check vs reference.
    fwd = jax.jit(functools.partial(llama_mlp_forward, tile_i=TILE_I,
                                    k_factor=k_factor, selection_method="topk"))
    out, stat, topk_idx = fwd(x, wgu, wd)
    out = jax.block_until_ready(out)
    assert out.shape == (batch, seq, hidden)
    assert jnp.allclose(out, ref_out, atol=1e-4, rtol=1e-4)
    assert stat.shape == (batch, intermediate)
    assert jnp.allclose(stat, ref_stat, atol=1e-2, rtol=1e-2)
    k = int(intermediate * k_factor)
    assert topk_idx is not None and topk_idx.shape == (batch, k)

    # 2) Stat-disabled path (k_factor == 0): down_proj only, smaller VMEM/work.
    fwd_nostat = jax.jit(functools.partial(llama_mlp_forward, tile_i=TILE_I,
                                           k_factor=0.0, selection_method="topk"))
    out_ns, stat_ns, idx_ns = fwd_nostat(x, wgu, wd)
    out_ns = jax.block_until_ready(out_ns)
    assert stat_ns is None and idx_ns is None
    assert jnp.allclose(out_ns, ref_out, atol=1e-4, rtol=1e-4)

    # 3) bf16 run (production matmul dtype; f32 accumulation inside the kernel).
    x16 = x.astype(jnp.bfloat16)
    wgu16, wd16 = wgu.astype(jnp.bfloat16), wd.astype(jnp.bfloat16)
    out16, _, _ = fwd(x16, wgu16, wd16)
    out16 = jax.block_until_ready(out16)
    assert jnp.allclose(out16.astype(jnp.float32), ref_out, atol=3e-2, rtol=3e-2)

    print("KERNEL_OK")
</pallas_src>

<mosaic_0001>
module attributes {stable_mosaic.version = 11 : i64} {
  func.func @_mlp_kernel(%arg0: i32, %arg1: i32, %arg2: i32, %arg3: memref<1x16x128xf32, #tpu.memory_space<vmem>>, %arg4: memref<128x256xf32, #tpu.memory_space<vmem>>, %arg5: memref<128x128xf32, #tpu.memory_space<vmem>>, %arg6: memref<1x16x128xf32, #tpu.memory_space<vmem>>, %arg7: memref<1x1x1x256xf32, #tpu.memory_space<vmem>>, %arg8: memref<16x128xf32, #tpu.memory_space<vmem>>, %arg9: memref<16x1xf32, #tpu.memory_space<vmem>>, %arg10: memref<2x16x128xf32, #tpu.memory_space<vmem>>) attributes {dimension_semantics = [#tpu.dimension_semantics<parallel>, #tpu.dimension_semantics<parallel>, #tpu.dimension_semantics<arbitrary>], iteration_bounds = array<i64: 2, 1, 2>, scalar_prefetch = 0 : i64, scratch_operands = 3 : i64, tpu.core_type = #tpu.core_type<tc>, window_params = [{transform_indices = @transform_0, window_bounds = array<i64: 1, 16, 128>}, {transform_indices = @transform_1, window_bounds = array<i64: 128, 256>}, {transform_indices = @transform_2, window_bounds = array<i64: 128, 128>}, {transform_indices = @transform_3, window_bounds = array<i64: 1, 16, 128>}, {transform_indices = @transform_4, window_bounds = array<i64: 1, 1, 1, 256>}]} {
    %c0_i32 = arith.constant 0 : i32
    %0 = arith.cmpi eq, %arg2, %c0_i32 : i32
    %1 = arith.extui %0 : i1 to i32
    %c0_i32_0 = arith.constant 0 : i32
    %2 = arith.cmpi ne, %1, %c0_i32_0 : i32
    scf.if %2 {
      %cst_21 = arith.constant 0.000000e+00 : f32
      %34 = vector.broadcast %cst_21 : f32 to vector<16x128xf32>
      %c0_22 = arith.constant 0 : index
      %c0_23 = arith.constant 0 : index
      %35 = vector.load %arg8[%c0_22, %c0_23] : memref<16x128xf32, #tpu.memory_space<vmem>>, vector<16x128xf32>
      tpu.vector_store %arg8[%c0_22, %c0_23], %34 {strides = array<i32>} : memref<16x128xf32, #tpu.memory_space<vmem>>, vector<16x128xf32>,
      %cst_24 = arith.constant 0.000000e+00 : f32
      %36 = vector.broadcast %cst_24 : f32 to vector<16x1xf32>
      %c0_25 = arith.constant 0 : index
      %c0_26 = arith.constant 0 : index
      %37 = vector.load %arg9[%c0_25, %c0_26] : memref<16x1xf32, #tpu.memory_space<vmem>>, vector<16x1xf32>
      tpu.vector_store %arg9[%c0_25, %c0_26], %36 {strides = array<i32>} : memref<16x1xf32, #tpu.memory_space<vmem>>, vector<16x1xf32>,
    } else {
    }
    %c0 = arith.constant 0 : index
    %c0_1 = arith.constant 0 : index
    %c0_2 = arith.constant 0 : index
    %3 = vector.load %arg3[%c0, %c0_1, %c0_2] : memref<1x16x128xf32, #tpu.memory_space<vmem>>, vector<1x16x128xf32>
    %4 = vector.shape_cast %3 : vector<1x16x128xf32> to vector<16x128xf32>
    %c0_3 = arith.constant 0 : index
    %c0_4 = arith.constant 0 : index
    %5 = vector.load %arg4[%c0_3, %c0_4] : memref<128x256xf32, #tpu.memory_space<vmem>>, vector<128x256xf32>
    %cst = arith.constant dense<0.000000e+00> : vector<16x256xf32>
    %6 = tpu.matmul %4, %5, %cst {dimension_numbers = #tpu.dot_dimension_numbers<[1], [0], [0], [1], [0, 0, 1, 1], [], []>} : vector<16x128xf32>, vector<128x256xf32>, vector<16x256xf32> -> vector<16x256xf32>
    %7 = vector.extract_strided_slice %6 {offsets = [0, 0], sizes = [16, 128], strides = [1, 1]} : vector<16x256xf32> to vector<16x128xf32>
    %8 = vector.extract_strided_slice %6 {offsets = [0, 128], sizes = [16, 128], strides = [1, 1]} : vector<16x256xf32> to vector<16x128xf32>
    %9 = arith.negf %7 : vector<16x128xf32>
    %10 = math.exp %9 : vector<16x128xf32>
    %cst_5 = arith.constant 1.000000e+00 : f32
    %11 = vector.broadcast %cst_5 : f32 to vector<16x128xf32>
    %12 = arith.addf %11, %10 : vector<16x128xf32>
    %13 = arith.divf %11, %12 : vector<16x128xf32>
    %14 = arith.mulf %7, %13 : vector<16x128xf32>
    %15 = arith.mulf %14, %8 : vector<16x128xf32>
    %16 = arith.mulf %15, %15 : vector<16x128xf32>
    %17 = arith.index_cast %arg2 : i32 to index
    %c0_6 = arith.constant 0 : index
    %c0_7 = arith.constant 0 : index
    %18 = vector.load %arg10[%17, %c0_6, %c0_7] : memref<2x16x128xf32, #tpu.memory_space<vmem>>, vector<1x16x128xf32>
    %19 = vector.shape_cast %18 : vector<1x16x128xf32> to vector<16x128xf32>
    %20 = vector.shape_cast %16 : vector<16x128xf32> to vector<1x16x128xf32>
    tpu.vector_store %arg10[%17, %c0_6, %c0_7], %20 {strides = array<i32>} : memref<2x16x128xf32, #tpu.memory_space<vmem>>, vector<1x16x128xf32>,
    %c0_8 = arith.constant 0 : index
    %c0_9 = arith.constant 0 : index
    %21 = vector.load %arg9[%c0_8, %c0_9] : memref<16x1xf32, #tpu.memory_space<vmem>>, vector<16x1xf32>
    %cst_10 = arith.constant dense<0.000000e+00> : vector<16xf32>
    %22 = vector.multi_reduction <add>, %16, %cst_10 [1] : vector<16x128xf32> to vector<16xf32>
    %23 = vector.shape_cast %22 : vector<16xf32> to vector<16x1xf32>
    %24 = arith.addf %21, %23 : vector<16x1xf32>
    %c0_11 = arith.constant 0 : index
    %c0_12 = arith.constant 0 : index
    %25 = vector.load %arg9[%c0_11, %c0_12] : memref<16x1xf32, #tpu.memory_space<vmem>>, vector<16x1xf32>
    tpu.vector_store %arg9[%c0_11, %c0_12], %24 {strides = array<i32>} : memref<16x1xf32, #tpu.memory_space<vmem>>, vector<16x1xf32>,
    %c0_13 = arith.constant 0 : index
    %c0_14 = arith.constant 0 : index
    %26 = vector.load %arg8[%c0_13, %c0_14] : memref<16x128xf32, #tpu.memory_space<vmem>>, vector<16x128xf32>
    %c0_15 = arith.constant 0 : index
    %c0_16 = arith.constant 0 : index
    %27 = vector.load %arg5[%c0_15, %c0_16] : memref<128x128xf32, #tpu.memory_space<vmem>>, vector<128x128xf32>
    %cst_17 = arith.constant dense<0.000000e+00> : vector<16x128xf32>
    %28 = tpu.matmul %15, %27, %cst_17 {dimension_numbers = #tpu.dot_dimension_numbers<[1], [0], [0], [1], [0, 0, 1, 1], [], []>} : vector<16x128xf32>, vector<128x128xf32>, vector<16x128xf32> -> vector<16x128xf32>
    %29 = arith.addf %26, %28 : vector<16x128xf32>
    %c0_18 = arith.constant 0 : index
    %c0_19 = arith.constant 0 : index
    %30 = vector.load %arg8[%c0_18, %c0_19] : memref<16x128xf32, #tpu.memory_space<vmem>>, vector<16x128xf32>
    tpu.vector_store %arg8[%c0_18, %c0_19], %29 {strides = array<i32>} : memref<16x128xf32, #tpu.memory_space<vmem>>, vector<16x128xf32>,
    %c1_i32 = arith.constant 1 : i32
    %31 = arith.cmpi eq, %arg2, %c1_i32 : i32
    %32 = arith.extui %31 : i1 to i32
    %c0_i32_20 = arith.constant 0 : i32
    %33 = arith.cmpi ne, %32, %c0_i32_20 : i32
    scf.if %33 {
      %c0_21 = arith.constant 0 : index
      %c0_22 = arith.constant 0 : index
      %34 = vector.load %arg8[%c0_21, %c0_22] : memref<16x128xf32, #tpu.memory_space<vmem>>, vector<16x128xf32>
      %c0_23 = arith.constant 0 : index
      %c0_24 = arith.constant 0 : index
      %c0_25 = arith.constant 0 : index
      %35 = vector.load %arg6[%c0_23, %c0_24, %c0_25] : memref<1x16x128xf32, #tpu.memory_space<vmem>>, vector<1x16x128xf32>
      %36 = vector.shape_cast %35 : vector<1x16x128xf32> to vector<16x128xf32>
      %37 = vector.shape_cast %34 : vector<16x128xf32> to vector<1x16x128xf32>
      tpu.vector_store %arg6[%c0_23, %c0_24, %c0_25], %37 {strides = array<i32>} : memref<1x16x128xf32, #tpu.memory_space<vmem>>, vector<1x16x128xf32>,
      %c0_26 = arith.constant 0 : index
      %c0_27 = arith.constant 0 : index
      %38 = vector.load %arg9[%c0_26, %c0_27] : memref<16x1xf32, #tpu.memory_space<vmem>>, vector<16x1xf32>
      %cst_28 = arith.constant 9.99999996E-13 : f32
      %39 = vector.broadcast %cst_28 : f32 to vector<16x1xf32>
      %40 = arith.addf %38, %39 : vector<16x1xf32>
      %41 = tpu.reciprocal %40 : vector<16x1xf32> -> vector<16x1xf32>
      %cst_29 = arith.constant 1.000000e+00 : f32
      %42 = vector.broadcast %cst_29 : f32 to vector<1x16xf32>
      %c0_30 = arith.constant 0 : index
      %c0_31 = arith.constant 0 : index
      %c0_32 = arith.constant 0 : index
      %43 = vector.load %arg10[%c0_30, %c0_31, %c0_32] : memref<2x16x128xf32, #tpu.memory_space<vmem>>, vector<1x16x128xf32>
      %44 = vector.shape_cast %43 : vector<1x16x128xf32> to vector<16x128xf32>
      %45 = vector.broadcast %41 : vector<16x1xf32> to vector<16x128xf32>
      %46 = arith.mulf %44, %45 : vector<16x128xf32>
      %cst_33 = arith.constant dense<0.000000e+00> : vector<1x128xf32>
      %47 = tpu.matmul %42, %46, %cst_33 {dimension_numbers = #tpu.dot_dimension_numbers<[1], [0], [0], [1], [0, 0, 1, 1], [], []>} : vector<1x16xf32>, vector<16x128xf32>, vector<1x128xf32> -> vector<1x128xf32>
      %c0_34 = arith.constant 0 : index
      %c0_35 = arith.constant 0 : index
      %c0_36 = arith.constant 0 : index
      %c0_37 = arith.constant 0 : index
      %48 = vector.load %arg7[%c0_34, %c0_35, %c0_36, %c0_37] : memref<1x1x1x256xf32, #tpu.memory_space<vmem>>, vector<1x1x1x128xf32>
      %49 = vector.shape_cast %48 : vector<1x1x1x128xf32> to vector<1x128xf32>
      %50 = vector.shape_cast %47 : vector<1x128xf32> to vector<1x1x1x128xf32>
      tpu.vector_store %arg7[%c0_34, %c0_35, %c0_36, %c0_37], %50 {strides = array<i32>} : memref<1x1x1x256xf32, #tpu.memory_space<vmem>>, vector<1x1x1x128xf32>,
      %c1 = arith.constant 1 : index
      %c0_38 = arith.constant 0 : index
      %c0_39 = arith.constant 0 : index
      %51 = vector.load %arg10[%c1, %c0_38, %c0_39] : memref<2x16x128xf32, #tpu.memory_space<vmem>>, vector<1x16x128xf32>
      %52 = vector.shape_cast %51 : vector<1x16x128xf32> to vector<16x128xf32>
      %53 = vector.broadcast %41 : vector<16x1xf32> to vector<16x128xf32>
      %54 = arith.mulf %52, %53 : vector<16x128xf32>
      %cst_40 = arith.constant dense<0.000000e+00> : vector<1x128xf32>
      %55 = tpu.matmul %42, %54, %cst_40 {dimension_numbers = #tpu.dot_dimension_numbers<[1], [0], [0], [1], [0, 0, 1, 1], [], []>} : vector<1x16xf32>, vector<16x128xf32>, vector<1x128xf32> -> vector<1x128xf32>
      %c0_41 = arith.constant 0 : index
      %c0_42 = arith.constant 0 : index
      %c0_43 = arith.constant 0 : index
      %c128 = arith.constant 128 : index
      %56 = vector.load %arg7[%c0_41, %c0_42, %c0_43, %c128] : memref<1x1x1x256xf32, #tpu.memory_space<vmem>>, vector<1x1x1x128xf32>
      %57 = vector.shape_cast %56 : vector<1x1x1x128xf32> to vector<1x128xf32>
      %58 = vector.shape_cast %55 : vector<1x128xf32> to vector<1x1x1x128xf32>
      tpu.vector_store %arg7[%c0_41, %c0_42, %c0_43, %c128], %58 {strides = array<i32>} : memref<1x1x1x256xf32, #tpu.memory_space<vmem>>, vector<1x1x1x128xf32>,
    } else {
    }
    return
  }
  func.func @transform_0(%arg0: i32, %arg1: i32, %arg2: i32) -> (i32, i32, i32) {
    %c0_i32 = arith.constant 0 : i32
    %c0_i32_0 = arith.constant 0 : i32
    return %arg0, %arg1, %c0_i32 : i32, i32, i32
  }
  func.func @transform_1(%arg0: i32, %arg1: i32, %arg2: i32) -> (i32, i32) {
    %c0_i32 = arith.constant 0 : i32
    %c0_i32_0 = arith.constant 0 : i32
    return %c0_i32, %arg2 : i32, i32
  }
  func.func @transform_2(%arg0: i32, %arg1: i32, %arg2: i32) -> (i32, i32) {
    %c0_i32 = arith.constant 0 : i32
    %c0_i32_0 = arith.constant 0 : i32
    return %arg2, %c0_i32 : i32, i32
  }
  func.func @transform_3(%arg0: i32, %arg1: i32, %arg2: i32) -> (i32, i32, i32) {
    %c0_i32 = arith.constant 0 : i32
    %c0_i32_0 = arith.constant 0 : i32
    return %arg0, %arg1, %c0_i32 : i32, i32, i32
  }
  func.func @transform_4(%arg0: i32, %arg1: i32, %arg2: i32) -> (i32, i32, i32, i32) {
    %c0_i32 = arith.constant 0 : i32
    %c0_i32_0 = arith.constant 0 : i32
    %c0_i32_1 = arith.constant 0 : i32
    return %arg0, %arg1, %c0_i32, %c0_i32_0 : i32, i32, i32, i32
  }
}

</mosaic_0001>

<bundles_post_ra>
// kernel: llama_mlp_forward.1
= control target key start
LH: loop header
LB: loop body
LE: loop exit
PB: predicated region body
PF: predicated region fallthrough
CT: control target
= control target key end

     0   :  { %s1615_s0 = inlined_call_operand.hbm [shape: f32[2,16,128], index: 0, kind: input, shape index: {}]   ;;  %s1616_s1 = inlined_call_operand.hbm [shape: f32[128,512], index: 1, kind: input, shape index: {}]   ;;  %s1617_s2 = inlined_call_operand.hbm [shape: f32[256,128], index: 2, kind: input, shape index: {}]   ;;  %s1618_s3 = inlined_call_operand.hbm [shape: f32[2,16,128], index: 3, kind: output, shape index: {0}]   ;;  %s1619_s4 = inlined_call_operand.vmem [shape: f32[2,1,1,256], index: 4, kind: output, shape index: {1}]  }
   0x1   :  { %1631 = sst [smem:[#allocation25_spill]] %s1616_s1 }
   0x2   :  { %1632 = sst [smem:[#allocation26_spill]] %s1618_s3 }
   0x3   :  { %1633 = sst [smem:[#allocation27_spill]] %s1619_s4 }
   0x4   :  { %10 = vsyncpa [#allocation6], 0 }
   0x5   :  { %12 = vsyncpa [#allocation6 + $0x1], 0 }
   0x6   :  { %13 = vsyncpa [#allocation9], 0 }
   0x7   :  { %15 = vsyncpa [#allocation9 + $0x1], 0 }
   0x8   :  { %16 = vsyncpa [#allocation7], 0 }
   0x9   :  { %18 = vsyncpa [#allocation7 + $0x1], 0  ;;  %s1293_s15 = smov 0   ;;  %s1295_s16 = smov 0  }
   0xa   :  { %s1297_s17 = smov 0   ;;  %s1299_s18 = smov 0  }
   0xb   :  { %s1301_s19 = smov 0   ;;  %s1303_s20 = smov 0  }
   0xc   :  { %s1305_s21 = smov 0   ;;  %s1307_s22 = smov 0  }
   0xd   :  { %s1309_s23 = smov 0   ;;  %s1311_s24 = smov 0  }
   0xe   :  { %s1313_s25 = smov 0  }
   0xf LB: > { %1634 = sst [smem:[#allocation15_spill]] %s1228_s18  ;;  %s36_s26 = sadd.s32 1, %s1248_s23  ;;  %s1256_s25 = sphi %s1313_s25, %s24_s25   ;;  %s1252_s24 = sphi %s1311_s24, %s1667_s24   ;;  %s1248_s23 = sphi %s1309_s23, %s1674_s23   ;;  %s1244_s22 = sphi %s1307_s22, %s1665_s22   ;;  %s1240_s21 = sphi %s1305_s21, %s1673_s21   ;;  %s1236_s20 = sphi %s1303_s20, %s1664_s20   ;;  %s1232_s19 = sphi %s1301_s19, %s1672_s19   ;;  %s1228_s18 = sphi %s1299_s18, %s1671_s18   ;;  %s1224_s17 = sphi %s1297_s17, %s1670_s17   ;;  %s1220_s16 = sphi %s1295_s16, %s1669_s16   ;;  %s1216_s15 = sphi %s1293_s15, %s1668_s15  }
  0x10   : > { %1635 = sst [smem:[#allocation16_spill]] %s1236_s20  ;;  %p60_p0 = scmp.eq.s32.totalorder %s1256_s25, 0 }
  0x11   : > { %1636 = sst [smem:[#allocation17_spill]] %s1240_s21  ;;  %p1350_p1 = scmp.ge.s32.totalorder %s36_s26, 2 }
  0x12   : > { %1637 = sst [smem:[#allocation18_spill]] %s1252_s24  ;;  %s78_s28 = sadd.s32 1, %s1224_s17 }
  0x13   : > { %p85_p2 = scmp.ne.s32.totalorder %s1224_s17, %s1220_s16  ;;  %p91_p3 = scmp.ne.s32.totalorder %s1220_s16, %s1216_s15 }
  0x14   : > { %s1676_s26 = smov (%p1350_p1, %s36_s26), 0  ;;  %p927_p5 = scmp.lt.s32.totalorder %s1256_s25, 4 }
  0x15   : > { %1639 = sst [smem:[#allocation19_spill]] %s1676_s26  ;;  %p1365_p4 = por %p85_p2, %p60_p0 }
  0x16   : > { %s75_s30 = ssub.s32 %s1248_s23, %s1676_s26  ;;  %s221_s5 = sand.u32 1, %s1256_s25  }
  0x17   : > { %p76_p6 = scmp.eq.s32.totalorder %s75_s30, 0  ;;  %s1621_s6 = sand.u32 1, %s1224_s17  }
  0x18   : > { %s861_s8 = sshll.u32 %s1621_s6, 8  ;;  %s886_s9 = sshll.u32 %s1248_s23, 4 }
  0x19   : > { %s1375_s7 = scalar_select %p76_p6, %s1224_s17, %s78_s28  }
  0x1a   : > { %s1642_s1 = sld [smem:[#allocation25_spill]]  ;;  %s225_s14 = scalar_lea.vmem [#allocation8], %s861_s8 }
  0x1b   : > { %1641 = sst [smem:[#allocation20_spill]] %s1375_s7  ;;  %s233_s26 = sshll.u32 %s225_s14, 4  ;;  %s234_s26 = int_to_ptr.vmem [resolvable:$true] %s233_s26 }
  0x1c   : > { %p1387_p7 = pnand %p927_p5, %p1365_p4  ;;  %p867_p8 = scmp.ge.s32.totalorder %s1256_s25, 1 }
  0x1d   : > { %s1392_s30 = scalar_lea.sflag [#allocation9], %s221_s5  ;;  %s1258_s8 = smov 512  }
  0x1e   : > { %s1260_s10 = smov 16   ;;  %p263_p9 = scmp.lt.s32.totalorder %s1256_s25, 5 }
  0x1f   : > { %s1403_s11 = sadd.s32 4294967295, %s1256_s25   ;;  %s855_s5 = sadd.s32 4294967294, %s1256_s25  }
  0x20   : > { %s230_s12 = scalar_lea.hbm %s1642_s1, %s886_s9  ;;  %s1259_s9 = smov 256  }
  0x21   : > { %s231_s13 = sshll.u32 %s230_s12, 4  ;;  %p1398_p10 = pnand %p867_p8, %p263_p9  ;;  %s232_s13 = int_to_ptr.hbm [resolvable:$true] %s231_s13 }
  0x22   : > { %919 = dma.hbm_to_vmem [thread:$0]  (!%p1387_p7), %s232_s13, 4096, %s234_s26, %s1392_s30, %s1258_s8, %s1259_s9, %s1260_s10  }
  0x23   : > { %s43_s12 = sadd.s32 1, %s1252_s24  ;;  %s52_s14 = sadd.s32 1, %s1236_s20 }
  0x24   : > { %s1678_s12 = smov (!%p1350_p1, %s43_s12), %s1252_s24  ;;  %p59_p11 = scmp.ne.s32.totalorder %s1236_s20, %s1232_s19 }
  0x25   : > { %p65_p12 = scmp.ne.s32.totalorder %s1232_s19, %s1228_s18  ;;  %p45_p13 = scmp.ge.s32.totalorder %s1678_s12, 2 }
  0x26   : > { %p66_p2 = scmp.eq.s32.totalorder %s1403_s11, 0  ;;  %p1418_p4 = por %p60_p0, %p59_p11 }
  0x27   : > { %p143_p6 = scmp.eq.s32.totalorder %s1403_s11, 3  ;;  %s1680_s12 = smov (%p45_p13, %s1678_s12), 0 }
  0x28   : > { %1646 = sst [smem:[#allocation21_spill]] %s1680_s12  ;;  %p1428_p8 = por %p66_p2, %p65_p12 }
  0x29   : > { %p1435_p1 = por %p91_p3, %p66_p2  ;;  %s47_s8 = ssub.s32 %s1252_s24, %s1680_s12 }
  0x2a   : > { %p1441_p0 = por %p143_p6, %p59_p11  ;;  %p50_p9 = scmp.eq.s32.totalorder %s47_s8, 0 }
  0x2b   : > { %p149_p13 = scmp.eq.s32.totalorder %s855_s5, 3  ;;  %s197_s10 = sand.u32 1, %s1236_s20  }
  0x2c   : > { %s1649_s9 = scalar_select %p1441_p0, 1, 0 }
  0x2d   : > { %s885_s6 = sshll.u32 %s1252_s24, 4  ;;  %p1453_p3 = por %p149_p13, %p65_p12 }
  0x2e   : > { %1650 = sst [smem:[#allocation22_spill]] %s1649_s9  ;;  %s858_s7 = sshll.u32 %s197_s10, 4 }
  0x2f   : > { %s1448_s1 = scalar_select %p50_p9, %s1236_s20, %s52_s14  }
  0x30   : > { %s1652_s15 = scalar_select %p1453_p3, 1, 0 }
  0x31   : > { %1651 = sst [smem:[#allocation23_spill]] %s1448_s1  ;;  %s208_s21 = scalar_lea.hbm %s1615_s0, %s885_s6 }
  0x32   : > { %1653 = sst [smem:[#allocation24_spill]] %s1652_s15  ;;  %s209_s4 = sshll.u32 %s208_s21, 4  ;;  %s210_s4 = int_to_ptr.hbm [resolvable:$true] %s209_s4 }
  0x33   : > { %s201_s9 = scalar_lea.vmem [#allocation5], %s858_s7  ;;  %p914_p11 = pnand %p927_p5, %p1418_p4 }
  0x34   : > { %s211_s5 = sshll.u32 %s201_s9, 4  ;;  %s1654_s14 = sand.u32 1, %s1224_s17   ;;  %s212_s5 = int_to_ptr.vmem [resolvable:$true] %s211_s5 }
  0x35   : > { %s864_s8 = sshll.u32 %s1654_s14, 7  ;;  %s198_s24 = scalar_lea.sflag [#allocation6], %s197_s10 }
  0x36   : > { %s1261_s1 = smov 128   ;;  %s1262_s20 = smov 8  }
  0x37   : > { %916 = dma.hbm_to_vmem [thread:$0]  (!%p914_p11), %s210_s4, 256, %s212_s5, %s198_s24, %s1261_s1, %s1261_s1, %s1262_s20  }
  0x38   : > { %s887_s15 = sshll.u32 %s1248_s23, 7  ;;  %s247_s6 = scalar_lea.vmem [#allocation10], %s864_s8 }
  0x39   : > { %s252_s21 = scalar_lea.hbm %s1617_s2, %s887_s15  ;;  %s255_s7 = sshll.u32 %s247_s6, 4  ;;  %s256_s7 = int_to_ptr.vmem [resolvable:$true] %s255_s7 }
  0x3a   : > { %s253_s12 = sshll.u32 %s252_s21, 4  ;;  %267 = sbr.rel (%p1398_p10) target bundleno = 717 (0x2cd), region = 32  ;;  %s254_s12 = int_to_ptr.hbm [resolvable:$true] %s253_s12 }
  0x3b   : > { %922 = dma.hbm_to_vmem [thread:$0]  (!%p1387_p7), %s254_s12, 2048, %s256_s7, %s1392_s30, %s1261_s1, %s1261_s1, %s1262_s20  }
  0x3c   : > { %s1476_s26 = sand.u32 (!%p1398_p10), 1, %s1232_s19  }
  0x3d   : > { %s868_s4 = sshll.u32 (!%p1398_p10), %s1476_s26, 4  ;;  %s270_s24 = scalar_lea.sflag (!%p1398_p10), [#allocation6], %s1476_s26 }
  0x3e   : > { %s1480_s18 = scalar_lea.vmem (!%p1398_p10), [#allocation5], %s868_s4 }
  0x3f   : > { %1203 = dma.done.wait (%p1428_p8), %s270_s24, 256  }
  0x40   : > { %1205 = vsyncadd (%p1428_p8), %s270_s24, 4294967040  ;;  %s279_s1 = sand.u32 1, %s1403_s11   ;;  %s281_s20 = sand.u32 1, %s1220_s16  }
  0x41   : > { %s869_s28 = sshll.u32 %s281_s20, 8  ;;  %s280_s30 = scalar_lea.sflag [#allocation9], %s279_s1 }
  0x42   : > { %s1488_s29 = scalar_lea.vmem [#allocation8], %s869_s28 }
  0x43   : > { %1207 = dma.done.wait (%p1435_p1), %s280_s30, 6144  }
  0x44   : > { %1209 = vsyncadd (%p1435_p1), %s280_s30, 4294961152  ;;  %s870_s9 = sshll.u32 %s281_s20, 7  ;;  %p341_p5 = scmp.lt.s32.totalorder %s1244_s22, 1 }
  0x45   : > { %s1655_s14 = sld [smem:[#allocation27_spill]]  ;;  %s1501_s8 = scalar_lea.vmem [#allocation10], %s870_s9 }
  0x46   : > { %s342_s27 = scalar_select %p341_p5, %s1244_s22, 1 }
  0x47   : > { %s1503_s3 = scalar_lea.vmem [#allocation11], %s868_s4  ;;  %s1656_s21 = sld [smem:[#allocation17_spill]] }
  0x48   : > { %s872_s10 = sshll.u32 %s342_s27, 1 }
  0x4b   : > { %s1499_s11 = scalar_lea.vmem %s1655_s14, %s872_s10 }
  0x4d   : > { %p873_p7 = scmp.ne.s32.totalorder %s1656_s21, 0 }
  0x4f   : > { %352 = sbr.rel (%p873_p7) target bundleno = 89 (0x59), region = 48 }
  0x54   : > { %vm355_vm0 = vcmask 7168   ;;  %v1263_v0 = vmov 0.0  }
  0x55   : > { %353 = vst [vmem:[#allocation2] sm:$0xff] %v1263_v0 }
  0x56   : > { %354 = vst [vmem:[#allocation2 + $0x8] sm:$0xff] %v1263_v0 }
  0x57   : > { %356 = vst.msk [vmem:[#allocation3] sm:$0xff] %vm355_vm0, %v1263_v0 }
  0x58   : > { %357 = vst.msk [vmem:[#allocation3 + $0x8] sm:$0xff] %vm355_vm0, %v1263_v0 }
  0x59 PF: > { %v390_v1 = vld [vmem:[%s1488_s29 + $0xf0] sm:$0xff]  ;;  %v388_v2 = vld [vmem:[%s1488_s29 + $0xe0] sm:$0xff]  ;;  %v391_v5 = vld [vmem:[%s1488_s29 + $0xf8] sm:$0xff]  ;;  %s1657_s13 = sld [smem:[#allocation17_spill]]  ;;  %vm494_vm9 = vcmask 7168  }
  0x5a   : > { %392 = vmatpush.msra.mxu0 %v390_v1  ;;  %889 = vmatpush.msra.mxu3 %v390_v1  ;;  %v386_v3 = vld [vmem:[%s1488_s29 + $0xd0] sm:$0xff]  ;;  %v384_v4 = vld [vmem:[%s1488_s29 + $0xc0] sm:$0xff]  ;;  %v389_v6 = vld [vmem:[%s1488_s29 + $0xe8] sm:$0xff] }
  0x5b   : > { %v382_v7 = vld [vmem:[%s1488_s29 + $0xb0] sm:$0xff]  ;;  %415 = vmatpush.msra.mxu1 %v391_v5  ;;  %v387_v8 = vld [vmem:[%s1488_s29 + $0xd8] sm:$0xff]  ;;  %v380_v9 = vld [vmem:[%s1488_s29 + $0xa0] sm:$0xff] }
  0x5c   : > { %393 = vmatpush.msra.mxu0 %v388_v2  ;;  %890 = vmatpush.msra.mxu3 %v388_v2  ;;  %v385_v10 = vld [vmem:[%s1488_s29 + $0xc8] sm:$0xff]  ;;  %v378_v11 = vld [vmem:[%s1488_s29 + $0x90] sm:$0xff]  ;;  %v383_v12 = vld [vmem:[%s1488_s29 + $0xb8] sm:$0xff] }
  0x5d   : > { %416 = vmatpush.msra.mxu1 %v389_v6  ;;  %v376_v13 = vld [vmem:[%s1488_s29 + $0x80] sm:$0xff]  ;;  %v381_v14 = vld [vmem:[%s1488_s29 + $0xa8] sm:$0xff]  ;;  %v374_v15 = vld [vmem:[%s1488_s29 + $0x70] sm:$0xff] }
  0x5e   : > { %394 = vmatpush.msra.mxu0 %v386_v3  ;;  %891 = vmatpush.msra.mxu3 %v386_v3  ;;  %v379_v16 = vld [vmem:[%s1488_s29 + $0x98] sm:$0xff]  ;;  %v372_v17 = vld [vmem:[%s1488_s29 + $0x60] sm:$0xff]  ;;  %v377_v18 = vld [vmem:[%s1488_s29 + $0x88] sm:$0xff] }
  0x5f   : > { %417 = vmatpush.msra.mxu1 %v387_v8  ;;  %v370_v19 = vld [vmem:[%s1488_s29 + $0x50] sm:$0xff]  ;;  %v375_v20 = vld [vmem:[%s1488_s29 + $0x78] sm:$0xff]  ;;  %v368_v21 = vld [vmem:[%s1488_s29 + $0x40] sm:$0xff]  ;;  %s876_s6 = sshll.u32 %s1657_s13, 4  ;;  %p877_p10 = scmp.ne.s32.totalorder %s1657_s13, 1 }
  0x60   : > { %395 = vmatpush.msra.mxu0 %v384_v4  ;;  %892 = vmatpush.msra.mxu3 %v384_v4  ;;  %v373_v22 = vld [vmem:[%s1488_s29 + $0x68] sm:$0xff]  ;;  %v366_v23 = vld [vmem:[%s1488_s29 + $0x30] sm:$0xff]  ;;  %v371_v24 = vld [vmem:[%s1488_s29 + $0x58] sm:$0xff]  ;;  %s483_s7 = scalar_lea.vmem [#allocation4], %s876_s6 }
  0x61   : > { %418 = vmatpush.msra.mxu1 %v385_v10  ;;  %v364_v25 = vld [vmem:[%s1488_s29 + $0x20] sm:$0xff]  ;;  %v369_v26 = vld [vmem:[%s1488_s29 + $0x48] sm:$0xff]  ;;  %v362_v27 = vld [vmem:[%s1488_s29 + $0x10] sm:$0xff] }
  0x62   : > { %396 = vmatpush.msra.mxu0 %v382_v7  ;;  %893 = vmatpush.msra.mxu3 %v382_v7  ;;  %v367_v28 = vld [vmem:[%s1488_s29 + $0x38] sm:$0xff]  ;;  %v360_v29 = vld [vmem:[%s1488_s29] sm:$0xff]  ;;  %v365_v32 = vld [vmem:[%s1488_s29 + $0x28] sm:$0xff] }
  0x63   : > { %419 = vmatpush.msra.mxu1 %v383_v12  ;;  %v358_v30 = vld [vmem:[%s1480_s18] sm:$0xff]  ;;  %v359_v31 = vld [vmem:[%s1480_s18 + $0x8] sm:$0xff] }
  0x64   : > { %397 = vmatpush.msra.mxu0 %v380_v9  ;;  %894 = vmatpush.msra.mxu3 %v380_v9  ;;  %v363_v33 = vld [vmem:[%s1488_s29 + $0x18] sm:$0xff]  ;;  %v361_v34 = vld [vmem:[%s1488_s29 + $0x8] sm:$0xff]  ;;  %v513_v36 = vld [vmem:[%s1501_s8 + $0x70] sm:$0xff] }
  0x65   : > { %420 = vmatpush.msra.mxu1 %v381_v14  ;;  %v514_v35 = vld [vmem:[%s1501_s8 + $0x78] sm:$0xff]  ;;  %v512_v37 = vld [vmem:[%s1501_s8 + $0x68] sm:$0xff]  ;;  %v511_v38 = vld [vmem:[%s1501_s8 + $0x60] sm:$0xff] }
  0x66   : > { %398 = vmatpush.msra.mxu0 %v378_v11  ;;  %895 = vmatpush.msra.mxu3 %v378_v11  ;;  %v510_v39 = vld [vmem:[%s1501_s8 + $0x58] sm:$0xff]  ;;  %v509_v40 = vld [vmem:[%s1501_s8 + $0x50] sm:$0xff]  ;;  %v508_v41 = vld [vmem:[%s1501_s8 + $0x48] sm:$0xff] }
  0x67   : > { %421 = vmatpush.msra.mxu1 %v379_v16  ;;  %515 = vmatpush.msra.mxu2 %v514_v35  ;;  %v507_v42 = vld [vmem:[%s1501_s8 + $0x40] sm:$0xff]  ;;  %v506_v43 = vld [vmem:[%s1501_s8 + $0x38] sm:$0xff]  ;;  %v505_v44 = vld [vmem:[%s1501_s8 + $0x30] sm:$0xff] }
  0x68   : > { %399 = vmatpush.msra.mxu0 %v376_v13  ;;  %896 = vmatpush.msra.mxu3 %v376_v13  ;;  %v504_v45 = vld [vmem:[%s1501_s8 + $0x28] sm:$0xff]  ;;  %v503_v46 = vld [vmem:[%s1501_s8 + $0x20] sm:$0xff]  ;;  %v502_v47 = vld [vmem:[%s1501_s8 + $0x18] sm:$0xff] }
  0x69   : > { %422 = vmatpush.msra.mxu1 %v377_v18  ;;  %516 = vmatpush.msra.mxu2 %v513_v36  ;;  %v501_v48 = vld [vmem:[%s1501_s8 + $0x10] sm:$0xff]  ;;  %v500_v49 = vld [vmem:[%s1501_s8 + $0x8] sm:$0xff]  ;;  %v499_v50 = vld [vmem:[%s1501_s8] sm:$0xff] }
  0x6a   : > { %400 = vmatpush.msra.mxu0 %v374_v15  ;;  %897 = vmatpush.msra.mxu3 %v374_v15 }
  0x6b   : > { %423 = vmatpush.msra.mxu1 %v375_v20  ;;  %517 = vmatpush.msra.mxu2 %v512_v37 }
  0x6c   : > { %401 = vmatpush.msra.mxu0 %v372_v17  ;;  %898 = vmatpush.msra.mxu3 %v372_v17 }
  0x6d   : > { %424 = vmatpush.msra.mxu1 %v373_v22  ;;  %518 = vmatpush.msra.mxu2 %v511_v38 }
  0x6e   : > { %402 = vmatpush.msra.mxu0 %v370_v19  ;;  %899 = vmatpush.msra.mxu3 %v370_v19 }
  0x6f   : > { %425 = vmatpush.msra.mxu1 %v371_v24  ;;  %519 = vmatpush.msra.mxu2 %v510_v39 }
  0x70   : > { %403 = vmatpush.msra.mxu0 %v368_v21  ;;  %900 = vmatpush.msra.mxu3 %v368_v21 }
  0x71   : > { %426 = vmatpush.msra.mxu1 %v369_v26  ;;  %520 = vmatpush.msra.mxu2 %v509_v40  ;;  %v487_v26 = vld [vmem:[#allocation3 + $0x8] sm:$0xff] }
  0x72   : > { %404 = vmatpush.msra.mxu0 %v366_v23  ;;  %901 = vmatpush.msra.mxu3 %v366_v23  ;;  %v486_v23 = vld [vmem:[#allocation3] sm:$0xff] }
  0x73   : > { %427 = vmatpush.msra.mxu1 %v367_v28  ;;  %521 = vmatpush.msra.mxu2 %v508_v41 }
  0x74   : > { %405 = vmatpush.msra.mxu0 %v364_v25  ;;  %902 = vmatpush.msra.mxu3 %v364_v25 }
  0x75   : > { %428 = vmatpush.msra.mxu1 %v365_v32  ;;  %522 = vmatpush.msra.mxu2 %v507_v42  ;;  %v498_v32 = vld [vmem:[#allocation2 + $0x8] sm:$0xff] }
  0x76   : > { %406 = vmatpush.msra.mxu0 %v362_v27  ;;  %903 = vmatpush.msra.mxu3 %v362_v27 }
  0x77   : > { %429 = vmatpush.msra.mxu1 %v363_v33  ;;  %523 = vmatpush.msra.mxu2 %v506_v43 }
  0x78   : > { %407 = vmatpush.msra.mxu0 %v360_v29  ;;  %904 = vmatpush.msra.mxu3 %v360_v29  ;;  %v497_v29 = vld [vmem:[#allocation2] sm:$0xff] }
  0x79   : > { %408 = vmatmul.f32.vlgmr.msra.gmra.mxu0 %v358_v30  ;;  %411 = vmatmul.f32.vlgmr.msra.gmra.mxu3 %v359_v31 }
  0x7a   : > { %430 = vmatpush.msra.mxu1 %v361_v34  ;;  %524 = vmatpush.msra.mxu2 %v505_v44 }
  0x7b   : > { %431 = vmatmul.f32.vlgmr.msra.gmra.mxu1 %v358_v30 }
  0x7c   : > { %525 = vmatpush.msra.mxu2 %v504_v45 }
  0x7e   : > { %526 = vmatpush.msra.mxu2 %v503_v46 }
  0x80   : > { %527 = vmatpush.msra.mxu2 %v502_v47 }
  0x82   : > { %528 = vmatpush.msra.mxu2 %v501_v48 }
  0x83   : > { %434 = vmatmul.f32.gmra.mxu1 %v359_v31 }
  0x84   : > { %529 = vmatpush.msra.mxu2 %v500_v49 }
  0x86   : > { %530 = vmatpush.msra.mxu2 %v499_v50 }
  0xf6   : > { %v409_v51 = vpop.f32.mrf.mxu0 }
  0xf7   : > { %v874_v52 = vmul.f32 -1.442695, %v409_v51 }
  0xf8   : > { %v432_v2 = vpop.f32.mrf.mxu1 }
  0xf9   : > { %1027 = vpow2.f32 %v874_v52 }
  0xfc   : > { %v412_v53 = vpop.f32.mrf.mxu3 }
  0xfd   : > { %v875_v54 = vmul.f32 -1.442695, %v412_v53 }
  0xff   : > { %v1028_v55 = vpop.eup %1027  ;;  %1029 = vpow2.f32 %v875_v54 }
 0x100   : > { %v444_v56 = vadd.f32 1.0, %v1028_v55  ;;  %v435_v19 = vpop.f32.mrf.mxu1 }
 0x102   : > { %1031 = vrcp.f32 %v444_v56  ;;  %v457_v62 = vand.u32 2147483648, %v444_v56  ;;  %v455_v0 = vand.u32 2147483647, %v444_v56  ;;  %vm451_vm2 = vweird.f32 %v444_v56 }
 0x104   : > { %v458_v5 = vor.u32 1.1754944e-38, %v457_v62  ;;  %vm456_vm4 = vcmp.eq.f32.partialorder %v455_v0, 8.507059e+37 }
 0x105   : > { %v1030_v57 = vpop.eup %1029 }
 0x106   : > { %v445_v58 = vadd.f32 1.0, %v1030_v57 }
 0x108   : > { %v1032_v59 = vpop.eup %1031  ;;  %1033 = vrcp.f32 %v445_v58  ;;  %v472_v9 = vand.u32 2147483648, %v445_v58  ;;  %v470_v12 = vand.u32 2147483647, %v445_v58  ;;  %vm466_vm6 = vweird.f32 %v445_v58 }
 0x109   : > { %v447_v60 = vmul.f32 %v1032_v59, %v444_v56  ;;  %vm452_vm1 = vweird.f32 %v1032_v59 }
 0x10a   : > { %vm453_vm3 = vmor %vm451_vm2, %vm452_vm1  ;;  %v473_v15 = vor.u32 1.1754944e-38, %v472_v9  ;;  %vm471_vm8 = vcmp.eq.f32.partialorder %v470_v12, 8.507059e+37 }
 0x10b   : > { %v448_v61 = vsub.f32 1.0, %v447_v60 }
 0x10d   : > { %v449_v63 = vmul.f32 %v1032_v59, %v448_v61 }
 0x10e   : > { %v1034_v1 = vpop.eup %1033 }
 0x10f   : > { %v450_v3 = vadd.f32 %v1032_v59, %v449_v63  ;;  %v462_v4 = vmul.f32 %v1034_v1, %v445_v58  ;;  %vm467_vm5 = vweird.f32 %v1034_v1 }
 0x110   : > { %vm468_vm7 = vmor %vm466_vm6, %vm467_vm5 }
 0x111   : > { %v454_v6 = vsel %vm453_vm3, %v1032_v59, %v450_v3  ;;  %v463_v7 = vsub.f32 1.0, %v462_v4 }
 0x112   : > { %v459_v8 = vsel %vm456_vm4, %v458_v5, %v454_v6 }
 0x113   : > { %v476_v10 = vmul.f32 %v459_v8, %v409_v51  ;;  %v464_v11 = vmul.f32 %v1034_v1, %v463_v7 }
 0x115   : > { %v465_v13 = vadd.f32 %v1034_v1, %v464_v11  ;;  %v478_v14 = vmul.f32 %v476_v10, %v432_v2 }
 0x117   : > { %v469_v16 = vsel %vm468_vm7, %v1034_v1, %v465_v13  ;;  %531 = vmatmul.f32.vlgmr.msra.gmra.mxu2 %v478_v14  ;;  %v480_v17 = vmul.f32 %v478_v14, %v478_v14 }
 0x118   : > { %v474_v18 = vsel %vm471_vm8, %v473_v15, %v469_v16 }
 0x119   : > { %v477_v20 = vmul.f32 %v474_v18, %v412_v53  ;;  %488 = vadd.xlane.f32.xlu0 %v480_v17  ;;  %484 = vst [vmem:[%s483_s7] sm:$0xff] %v480_v17 }
 0x11b   : > { %v479_v21 = vmul.f32 %v477_v20, %v435_v19 }
 0x11d   : > { %v481_v22 = vmul.f32 %v479_v21, %v479_v21 }
 0x11f   : > { %534 = vmatmul.f32.gmra.mxu2 %v479_v21  ;;  %485 = vst [vmem:[%s483_s7 + $0x8] sm:$0xff] %v481_v22 }
 0x121   : > { %490 = vadd.xlane.f32.xlu0 %v481_v22 }
 0x18c   : > { %v489_v24 = vpop.xlane.xlu0 %488 }
 0x18d   : > { %v492_v25 = vadd.f32 %v489_v24, %v486_v23 }
 0x18f   : > { %495 = vst.msk [vmem:[#allocation3] sm:$0xff] %vm494_vm9, %v492_v25 }
 0x194   : > { %v491_v27 = vpop.xlane.xlu0 %490 }
 0x195   : > { %v493_v28 = vadd.f32 %v491_v27, %v487_v26 }
 0x197   : > { %496 = vst.msk [vmem:[#allocation3 + $0x8] sm:$0xff] %vm494_vm9, %v493_v28 }
 0x19a   : > { %v532_v30 = vpop.f32.mrf.mxu2 }
 0x19b   : > { %v538_v31 = vadd.f32 %v532_v30, %v497_v29 }
 0x19d   : > { %540 = vst [vmem:[#allocation2] sm:$0xff] %v538_v31 }
 0x1a1   : > { %545 = sbr.rel (%p877_p10) target bundleno = 696 (0x2b8), region = 52 }
 0x1a2   : > { %v535_v33 = vpop.f32.mrf.mxu2 }
 0x1a3   : > { %v539_v34 = vadd.f32 %v535_v33, %v498_v32 }
 0x1a5   : > { %541 = vst [vmem:[#allocation2 + $0x8] sm:$0xff] %v539_v34 }
 0x1a6   : > { %v551_v35 = vld [vmem:[#allocation3 + $0x8] sm:$0xff]  ;;  %v550_v36 = vld [vmem:[#allocation3] sm:$0xff]  ;;  %v1264_v37 = vmov 0   ;;  %v546_v60 = vld [vmem:[#allocation2] sm:$0xff]  ;;  %vm596_vm2 = vcmask 130048   ;;  %v1265_v8 = vmov 1.0   ;;  %v620_v9 = vlaneseq }
 0x1a7   : > { %1035 = vset.pattern.permute.xlu0 %v1264_v37  ;;  %v553_v38 = vadd.f32 1e-12, %v551_v35  ;;  %v552_v39 = vadd.f32 1e-12, %v550_v36  ;;  %548 = vst [vmem:[%s1503_s3] sm:$0xff] %v546_v60  ;;  %v583_v62 = vld [vmem:[#allocation4 + $0x8] sm:$0xff]  ;;  %v627_v63 = vld [vmem:[#allocation4 + $0x18] sm:$0xff] }
 0x1a8   : > { %v582_v3 = vld [vmem:[#allocation4] sm:$0xff]  ;;  %v626_v4 = vld [vmem:[#allocation4 + $0x10] sm:$0xff]  ;;  %vm622_vm3 = vcmp.lt.s32.totalorder %v620_v9, 128 }
 0x1a9   : > { %1036 = vrcp.f32 %v553_v38  ;;  %v579_v43 = vand.u32 2147483648, %v553_v38  ;;  %vm573_vm10 = vweird.f32 %v553_v38  ;;  %v577_v46 = vand.u32 2147483647, %v553_v38 }
 0x1aa   : > { %1038 = vrcp.f32 %v552_v39  ;;  %vm559_vm14 = vweird.f32 %v552_v39  ;;  %v565_v52 = vand.u32 2147483648, %v552_v39  ;;  %v563_v55 = vand.u32 2147483647, %v552_v39 }
 0x1ab   : > { %v580_v49 = vor.u32 1.1754944e-38, %v579_v43  ;;  %vm578_vm13 = vcmp.eq.f32.partialorder %v577_v46, 8.507059e+37 }
 0x1ac   : > { %v566_v57 = vor.u32 1.1754944e-38, %v565_v52  ;;  %vm564_vm1 = vcmp.eq.f32.partialorder %v563_v55, 8.507059e+37  ;;  %v547_v61 = vld [vmem:[#allocation2 + $0x8] sm:$0xff] }
 0x1ad   : > { %549 = vst [vmem:[%s1503_s3 + $0x8] sm:$0xff] %v547_v61 }
 0x1af   : > { %v1037_v40 = vpop.eup %1036 }
 0x1b0   : > { %v1039_v41 = vpop.eup %1038  ;;  %v569_v42 = vmul.f32 %v1037_v40, %v553_v38  ;;  %vm574_vm11 = vweird.f32 %v1037_v40 }
 0x1b1   : > { %v555_v44 = vmul.f32 %v1039_v41, %v552_v39  ;;  %vm575_vm12 = vmor %vm573_vm10, %vm574_vm11  ;;  %vm560_vm15 = vweird.f32 %v1039_v41 }
 0x1b2   : > { %v570_v45 = vsub.f32 1.0, %v569_v42  ;;  %vm561_vm0 = vmor %vm559_vm14, %vm560_vm15 }
 0x1b3   : > { %v556_v47 = vsub.f32 1.0, %v555_v44 }
 0x1b4   : > { %v571_v48 = vmul.f32 %v1037_v40, %v570_v45 }
 0x1b5   : > { %v557_v50 = vmul.f32 %v1039_v41, %v556_v47 }
 0x1b6   : > { %v572_v51 = vadd.f32 %v1037_v40, %v571_v48 }
 0x1b7   : > { %v558_v54 = vadd.f32 %v1039_v41, %v557_v50 }
 0x1b8   : > { %v576_v53 = vsel %vm575_vm12, %v1037_v40, %v572_v51 }
 0x1b9   : > { %v581_v56 = vsel %vm578_vm13, %v580_v49, %v576_v53  ;;  %v562_v58 = vsel %vm561_vm0, %v1039_v41, %v558_v54 }
 0x1ba   : > { %591 = vperm.xlu0 %1035, %v581_v56   ;;  %v567_v59 = vsel %vm564_vm1, %v566_v57, %v562_v58 }
 0x1c2   : > { %586 = vperm.xlu0 %1035, %v567_v59  }
 0x22c   : > { %v592_v0 = vpop.permute.xlu0 %591 }
 0x22d   : > { %v595_v1 = vmul.f32 %v592_v0, %v583_v62  ;;  %v629_v2 = vmul.f32 %v627_v63, %v592_v0 }
 0x22f   : > { %614 = vmatpush.msra.mxu0 %v595_v1  ;;  %644 = vmatpush.msra.mxu1 %v629_v2 }
 0x234   : > { %v587_v5 = vpop.permute.xlu0 %586 }
 0x235   : > { %v594_v6 = vmul.f32 %v587_v5, %v582_v3  ;;  %v628_v7 = vmul.f32 %v626_v4, %v587_v5 }
 0x237   : > { %615 = vmatpush.msra.mxu0 %v594_v6  ;;  %645 = vmatpush.msra.mxu1 %v628_v7 }
 0x238   : > { %878 = vmatmul.msk.f32.vlgmr.msra.gmra.mxu0 %vm596_vm2, %v1265_v8  ;;  %879 = vmatmul.msk.f32.vlgmr.msra.gmra.mxu1 %vm596_vm2, %v1265_v8 }
 0x2b5   : > { %v617_v10 = vpop.f32.mrf.mxu0  ;;  %v647_v11 = vpop.f32.mrf.mxu1 }
 0x2b6   : > { %624 = vst.msk [vmem:[%s1499_s11] sm:$0x1] %vm622_vm3, %v617_v10 }
 0x2b7   : > { %650 = vst.msk [vmem:[%s1499_s11 + $0x1] sm:$0x1] %vm622_vm3, %v647_v11 }
 0x2b8 PF: > { %s888_s4 = sshll.u32 %s1244_s22, 4  ;;  %s1659_s1 = sld [smem:[#allocation26_spill]] }
 0x2b9   : > { %s674_s28 = sshll.u32 %s1503_s3, 4  ;;  %s652_s29 = scalar_lea.sflag [#allocation7], %s1476_s26  ;;  %s675_s28 = int_to_ptr.vmem [resolvable:$true] %s674_s28 }
 0x2be   : > { %s673_s20 = scalar_lea.hbm %s1659_s1, %s888_s4  ;;  %s1150_s22 = scalar_lea.hbm %s1659_s1, 32 }
 0x2bf   : > { %s676_s30 = sshll.u32 %s673_s20, 4  ;;  %s677_s30 = int_to_ptr.hbm [resolvable:$true] %s676_s30 }
 0x2c0   : > { %s1144_s9 = sshra.s32 %s677_s30, 4  ;;  %s1145_s9 = int_to_ptr.hbm [resolvable:$true] %s1144_s9 }
 0x2c1   : > { %s1146_s27 = scalar_lea.hbm %s1145_s9, 16  ;;  %p1151_p6 = scmp.lt.s32.totalorder %s1145_s9, %s1659_s1 }
 0x2c2   : > { %p1147_p12 = scmp.ne.s32.totalorder %s1145_s9, %s1146_s27  ;;  %p1152_p8 = scmp.lt.s32.totalorder %s1150_s22, %s1146_s27 }
 0x2c4   : > { %p1148_p2 = pnand %p1147_p12, %p1441_p0  ;;  %p1153_p1 = por %p1152_p8, %p1151_p6 }
 0x2c6   : > { %p1149_p4 = pneg %p1148_p2 }
 0x2c8   : > { %p1154_p9 = pnand %p1153_p1, %p1149_p4 }
 0x2ca   : > { %1157 = shalt.err (!%p1154_p9)
}
 0x2cb   : > { %s1266_s26 = smov 128   ;;  %s1267_s11 = smov 8  }
 0x2cc   : > { %911 = dma.vmem_to_hbm [thread:$0]  (%p1441_p0), %s675_s28, 256, %s677_s30, %s652_s29, %s1266_s26, %s1266_s26, %s1267_s11  }
 0x2cd PF: > { %s1660_s8 = sld [smem:[#allocation15_spill]]  ;;  %p928_p13 = scmp.ge.s32.totalorder %s1256_s25, 2 }
 0x2cf   : > { %p924_p11 = pnand %p928_p13, %p1453_p3 }
 0x2d1   : > { %p925_p5 = pneg %p924_p11 }
 0x2d3   : > { %s694_s21 = sand.u32 1, %s1660_s8  }
 0x2d4   : > { %s695_s13 = scalar_lea.sflag [#allocation7], %s694_s21 }
 0x2d5   : > { %1211 = dma.done.wait (%p925_p5), %s695_s13, 256  }
 0x2d6   : > { %1213 = vsyncadd (%p925_p5), %s695_s13, 4294967040  ;;  %s24_s25 = sadd.s32 1, %s1256_s25   ;;  %s1662_s6 = sld [smem:[#allocation20_spill]] }
 0x2d7   : > { %p21_p7 = scmp.ge.s32.totalorder %s24_s25, 6   ;;  %s1663_s7 = sld [smem:[#allocation16_spill]] }
 0x2d8   : > { %s1664_s20 = sld [smem:[#allocation23_spill]]  ;;  %s1668_s15 = smov %s1220_s16 }
 0x2d9   : > { %s1665_s22 = sld [smem:[#allocation18_spill]]  ;;  %s1669_s16 = smov %s1224_s17 }
 0x2da   : > { %s1666_s12 = sld [smem:[#allocation19_spill]]  ;;  %s1671_s18 = smov %s1232_s19 }
 0x2db   : > { %s1667_s24 = sld [smem:[#allocation21_spill]]  ;;  %s1673_s21 = smov %s1248_s23 }
 0x2dc   : > { %s1670_s17 = smov %s1662_s6  ;;  %23 = sbr.rel (!%p21_p7) target bundleno = 15 (0xf), region = 123 }
 0x2dd   : > { %s1672_s19 = smov %s1663_s7 }
 0x2e0   : > { %s1674_s23 = smov %s1666_s12 }
 0x2e1   :  { %712 = vsyncpa [#allocation6], 1 }
 0x2e2   :  { %714 = vsyncpa [#allocation6 + $0x1], 1 }
 0x2e3   :  { %715 = vsyncpa [#allocation9], 1 }
 0x2e4   :  { %717 = vsyncpa [#allocation9 + $0x1], 1 }
 0x2e5   :  { %718 = vsyncpa [#allocation7], 1 }
 0x2e6   :  { %720 = vsyncpa [#allocation7 + $0x1], 1 }

</bundles_post_ra>
